<compile_context>
chip_gen: v6e
topology: v6e:2x2x1
jax: 0.10.0
libtpu: 0.0.40
codegen_flags: <defaults>
</compile_context>

<pallas_src>
import jax
import jax.numpy as jnp
from jax import lax
from jax.experimental import pallas as pl
from jax.experimental.pallas import tpu as pltpu

EPS = 1e-5


def addnorm_kernel(x_ref, y_ref, g_ref, b_ref, o_ref):
    # x_ref / y_ref / o_ref: (TILE_ROWS, H) streamed tiles; g_ref / b_ref: (1, H) resident.
    z = x_ref[...].astype(jnp.float32) + y_ref[...].astype(jnp.float32)
    mean = jnp.mean(z, axis=-1, keepdims=True)          # XLU reduction
    zc = z - mean
    var = jnp.mean(zc * zc, axis=-1, keepdims=True)     # biased variance (PyTorch LN)
    inv = lax.rsqrt(var + EPS)                          # EUP slot
    out = zc * inv * g_ref[...].astype(jnp.float32) + b_ref[...].astype(jnp.float32)
    o_ref[...] = out.astype(o_ref.dtype)


def _choose_tile_rows(rows, H, itemsize):
    """Largest row tile whose double-buffered streams + fp32 temporaries fit a
    conservative cross-generation VMEM budget (v7x has only 64 MiB per TC)."""
    # (8,128) sublane constraint: fp32 -> multiple of 8 rows, bf16 -> 16, int8/fp8 -> 32.
    row_align = 8 if itemsize >= 4 else (16 if itemsize == 2 else 32)
    budget = 32 * 1024 * 1024
    # 3 HBM streams (x, y, out) x 2 pipeline buffers + ~2 fp32 temporaries (z, zc).
    per_row = 3 * 2 * H * itemsize + 2 * H * 4
    tile = (budget // per_row) // row_align * row_align
    tile = max(row_align, min(tile, 1024))     # >1024 rows buys no extra roofline
    tile = min(tile, pl.cdiv(rows, row_align) * row_align)
    return int(tile)


def add_norm(x, y, gamma, beta):
    """x, y: (B, S, H); gamma, beta: (H,). Returns LayerNorm(y + x) over H."""
    B, S, H = x.shape
    rows = B * S
    itemsize = jnp.dtype(x.dtype).itemsize
    tile_rows = _choose_tile_rows(rows, H, itemsize)
    grid = (pl.cdiv(rows, tile_rows),)

    x2 = x.reshape(rows, H)
    y2 = y.reshape(rows, H)
    g2 = gamma.reshape(1, H)
    b2 = beta.reshape(1, H)

    # VMEM limit sized to the double-buffered footprint with headroom: safe on v7x's
    # 64 MiB physical VMEM, plenty of slack on v5e/v6e (and above v5e's 16 MiB default).
    stream_bytes = 3 * 2 * tile_rows * H * itemsize
    temp_bytes = 2 * tile_rows * H * 4
    vmem_limit = min(96 * 1024 * 1024,
                     max(32 * 1024 * 1024, int(1.5 * (stream_bytes + temp_bytes))))

    # Purely HBM-bound kernel (read x, read y, write out); hint the scheduler.
    cost = pl.CostEstimate(
        flops=7 * rows * H,
        transcendentals=rows,
        bytes_accessed=3 * rows * H * itemsize + 2 * H * 4,
    )

    out2 = pl.pallas_call(
        addnorm_kernel,
        out_shape=jax.ShapeDtypeStruct((rows, H), x.dtype),
        grid_spec=pltpu.PrefetchScalarGridSpec(
            num_scalar_prefetch=0,
            grid=grid,
            in_specs=[
                pl.BlockSpec((tile_rows, H), lambda i: (i, 0)),   # x tile (streamed)
                pl.BlockSpec((tile_rows, H), lambda i: (i, 0)),   # y tile (streamed)
                pl.BlockSpec((1, H), lambda i: (0, 0)),           # gamma (resident)
                pl.BlockSpec((1, H), lambda i: (0, 0)),           # beta  (resident)
            ],
            out_specs=pl.BlockSpec((tile_rows, H), lambda i: (i, 0)),
        ),
        compiler_params=pltpu.CompilerParams(
            # Row tiles are independent -> shard the grid across both TCs on v7x.
            dimension_semantics=("parallel",),
            vmem_limit_bytes=vmem_limit,
        ),
        cost_estimate=cost,
    )(x2, y2, g2, b2)
    return out2.reshape(B, S, H)


def add_norm_ref(x, y, gamma, beta):
    z = (y + x).astype(jnp.float32)
    mean = jnp.mean(z, axis=-1, keepdims=True)
    var = jnp.mean(jnp.square(z - mean), axis=-1, keepdims=True)
    return ((z - mean) * lax.rsqrt(var + EPS) * gamma + beta).astype(x.dtype)


if __name__ == "__main__":
    B, S, H = 2, 8, 32
    key = jax.random.PRNGKey(0)
    kx, ky = jax.random.split(key)
    x = jax.random.normal(kx, (B, S, H), dtype=jnp.float32)
    y = jax.random.normal(ky, (B, S, H), dtype=jnp.float32)
    # Deterministic LayerNorm params (PyTorch default init: gamma=1, beta=0).
    gamma = jnp.ones((H,), dtype=jnp.float32)
    beta = jnp.zeros((H,), dtype=jnp.float32)

    out = add_norm(x, y, gamma, beta)
    jax.block_until_ready(out)

    ref = add_norm_ref(x, y, gamma, beta)
    assert jnp.allclose(out, ref, atol=1e-5, rtol=1e-5), "mismatch vs reference"
    print("KERNEL_OK")
</pallas_src>

<mosaic_0001>
module attributes {stable_mosaic.version = 11 : i64} {
  func.func @addnorm_kernel(%arg0: i32, %arg1: memref<16x32xf32, #tpu.memory_space<vmem>>, %arg2: memref<16x32xf32, #tpu.memory_space<vmem>>, %arg3: memref<1x32xf32, #tpu.memory_space<vmem>>, %arg4: memref<1x32xf32, #tpu.memory_space<vmem>>, %arg5: memref<16x32xf32, #tpu.memory_space<vmem>>) attributes {dimension_semantics = [#tpu.dimension_semantics<parallel>], iteration_bounds = array<i64: 1>, scalar_prefetch = 0 : i64, scratch_operands = 0 : i64, tpu.core_type = #tpu.core_type<tc>, window_params = [{transform_indices = @transform_0, window_bounds = array<i64: 16, 32>}, {transform_indices = @transform_1, window_bounds = array<i64: 16, 32>}, {pipeline_mode = #tpu.pipeline_mode<synchronous>, transform_indices = @transform_2, window_bounds = array<i64: 1, 32>}, {pipeline_mode = #tpu.pipeline_mode<synchronous>, transform_indices = @transform_3, window_bounds = array<i64: 1, 32>}, {transform_indices = @transform_4, window_bounds = array<i64: 16, 32>}]} {
    %c0 = arith.constant 0 : index
    %c0_0 = arith.constant 0 : index
    %0 = vector.load %arg1[%c0, %c0_0] : memref<16x32xf32, #tpu.memory_space<vmem>>, vector<16x32xf32>
    %c0_1 = arith.constant 0 : index
    %c0_2 = arith.constant 0 : index
    %1 = vector.load %arg2[%c0_1, %c0_2] : memref<16x32xf32, #tpu.memory_space<vmem>>, vector<16x32xf32>
    %2 = arith.addf %0, %1 : vector<16x32xf32>
    %cst = arith.constant dense<0.000000e+00> : vector<16xf32>
    %3 = vector.multi_reduction <add>, %2, %cst [1] : vector<16x32xf32> to vector<16xf32>
    %4 = vector.shape_cast %3 : vector<16xf32> to vector<16x1xf32>
    %cst_3 = arith.constant 3.200000e+01 : f32
    %5 = vector.broadcast %cst_3 : f32 to vector<16x1xf32>
    %6 = arith.divf %4, %5 : vector<16x1xf32>
    %7 = vector.broadcast %6 : vector<16x1xf32> to vector<16x32xf32>
    %8 = arith.subf %2, %7 : vector<16x32xf32>
    %9 = arith.mulf %8, %8 : vector<16x32xf32>
    %cst_4 = arith.constant dense<0.000000e+00> : vector<16xf32>
    %10 = vector.multi_reduction <add>, %9, %cst_4 [1] : vector<16x32xf32> to vector<16xf32>
    %11 = vector.shape_cast %10 : vector<16xf32> to vector<16x1xf32>
    %cst_5 = arith.constant 3.200000e+01 : f32
    %12 = vector.broadcast %cst_5 : f32 to vector<16x1xf32>
    %13 = arith.divf %11, %12 : vector<16x1xf32>
    %cst_6 = arith.constant 9.99999974E-6 : f32
    %14 = vector.broadcast %cst_6 : f32 to vector<16x1xf32>
    %15 = arith.addf %13, %14 : vector<16x1xf32>
    %16 = math.rsqrt %15 : vector<16x1xf32>
    %17 = vector.broadcast %16 : vector<16x1xf32> to vector<16x32xf32>
    %18 = arith.mulf %8, %17 : vector<16x32xf32>
    %c0_7 = arith.constant 0 : index
    %c0_8 = arith.constant 0 : index
    %19 = vector.load %arg3[%c0_7, %c0_8] : memref<1x32xf32, #tpu.memory_space<vmem>>, vector<1x32xf32>
    %20 = vector.broadcast %19 : vector<1x32xf32> to vector<16x32xf32>
    %21 = arith.mulf %18, %20 : vector<16x32xf32>
    %c0_9 = arith.constant 0 : index
    %c0_10 = arith.constant 0 : index
    %22 = vector.load %arg4[%c0_9, %c0_10] : memref<1x32xf32, #tpu.memory_space<vmem>>, vector<1x32xf32>
    %23 = vector.broadcast %22 : vector<1x32xf32> to vector<16x32xf32>
    %24 = arith.addf %21, %23 : vector<16x32xf32>
    %c0_11 = arith.constant 0 : index
    %c0_12 = arith.constant 0 : index
    %25 = vector.load %arg5[%c0_11, %c0_12] : memref<16x32xf32, #tpu.memory_space<vmem>>, vector<16x32xf32>
    tpu.vector_store %arg5[%c0_11, %c0_12], %24 {strides = array<i32>} : memref<16x32xf32, #tpu.memory_space<vmem>>, vector<16x32xf32>,
    return
  }
  func.func @transform_0(%arg0: i32) -> (i32, i32) {
    %c0_i32 = arith.constant 0 : i32
    %c0_i32_0 = arith.constant 0 : i32
    return %arg0, %c0_i32 : i32, i32
  }
  func.func @transform_1(%arg0: i32) -> (i32, i32) {
    %c0_i32 = arith.constant 0 : i32
    %c0_i32_0 = arith.constant 0 : i32
    return %arg0, %c0_i32 : i32, i32
  }
  func.func @transform_2(%arg0: i32) -> (i32, i32) {
    %c0_i32 = arith.constant 0 : i32
    %c0_i32_0 = arith.constant 0 : i32
    %c0_i32_1 = arith.constant 0 : i32
    return %c0_i32, %c0_i32_0 : i32, i32
  }
  func.func @transform_3(%arg0: i32) -> (i32, i32) {
    %c0_i32 = arith.constant 0 : i32
    %c0_i32_0 = arith.constant 0 : i32
    %c0_i32_1 = arith.constant 0 : i32
    return %c0_i32, %c0_i32_0 : i32, i32
  }
  func.func @transform_4(%arg0: i32) -> (i32, i32) {
    %c0_i32 = arith.constant 0 : i32
    %c0_i32_0 = arith.constant 0 : i32
    return %arg0, %c0_i32 : i32, i32
  }
}

</mosaic_0001>

<bundles_post_ra>
// kernel: tpu_custom_call.1
= control target key start
LH: loop header
LB: loop body
LE: loop exit
PB: predicated region body
PF: predicated region fallthrough
CT: control target
= control target key end

     0   :  { %9 = vsyncpa [#allocation3], 0  ;;  %s255_s0 = inlined_call_operand.hbm [shape: f32[16,32], index: 0, kind: input, shape index: {}]   ;;  %s256_s1 = inlined_call_operand.hbm [shape: f32[16,32], index: 1, kind: input, shape index: {}]   ;;  %s257_s2 = inlined_call_operand.vmem [shape: f32[1,32], index: 2, kind: input, shape index: {}]   ;;  %s258_s3 = inlined_call_operand.vmem [shape: f32[1,32], index: 3, kind: input, shape index: {}]   ;;  %s259_s4 = inlined_call_operand.hbm [shape: f32[16,32], index: 4, kind: output, shape index: {}]  }
   0x1   :  { %10 = vsyncpa [#allocation6], 0 }
   0x2   :  { %11 = vsyncpa [#allocation4], 0  ;;  %s195_s15 = smov [#allocation2]  }
   0x3   :  { %s17_s16 = sshll.u32 %s195_s15, 4  ;;  %s18_s16 = int_to_ptr.vmem [resolvable:$true] %s17_s16 }
   0x4   :  { %s137_s17 = scalar_lea.vmem %s18_s16, 256  ;;  %p142_p1 = scmp.lt.s32.totalorder %s18_s16, %s18_s16 }
   0x5   :  { %p138_p0 = scmp.ne.s32.totalorder %s18_s16, %s137_s17  ;;  %p143_p2 = scmp.lt.s32.totalorder %s137_s17, %s137_s17 }
   0x7   :  { %p144_p3 = por %p143_p2, %p142_p1 }
   0x9   :  { %p145_p4 = pnand %p144_p3, %p138_p0 }
   0xb   :  { %148 = shalt.err (!%p145_p4)
}
   0xc   :  { %s196_s18 = smov 128   ;;  %s197_s19 = smov 8  }
   0xd   :  { %23 = dma.hbm_to_vmem [thread:$0]  %s255_s0, 256, %s18_s16, [#allocation3], %s196_s18, %s196_s18, %s197_s19  }
   0xe   :  { %s198_s22 = smov [#allocation5]  }
   0xf   :  { %s29_s23 = sshll.u32 %s198_s22, 4  ;;  %s30_s23 = int_to_ptr.vmem [resolvable:$true] %s29_s23 }
  0x10   :  { %s157_s24 = scalar_lea.vmem %s30_s23, 256  ;;  %p162_p6 = scmp.lt.s32.totalorder %s30_s23, %s30_s23 }
  0x11   :  { %p158_p5 = scmp.ne.s32.totalorder %s30_s23, %s157_s24  ;;  %p163_p7 = scmp.lt.s32.totalorder %s157_s24, %s157_s24 }
  0x13   :  { %p164_p8 = por %p163_p7, %p162_p6 }
  0x15   :  { %p165_p9 = pnand %p164_p8, %p158_p5 }
  0x17   :  { %168 = shalt.err (!%p165_p9)
}
  0x18   :  { %35 = dma.hbm_to_vmem [thread:$0]  %s256_s1, 256, %s30_s23, [#allocation6], %s196_s18, %s196_s18, %s197_s19  }
  0x19   :  { %189 = dma.done.wait [#allocation3], 256  }
  0x1a   :  { %190 = vsyncadd [#allocation3], 4294967040 }
  0x1b   :  { %191 = dma.done.wait [#allocation6], 256  }
  0x1c   :  { %192 = vsyncadd [#allocation6], 4294967040  ;;  %v46_v0 = vld [vmem:[#allocation2] sm:$0xff]  ;;  %v48_v1 = vld [vmem:[#allocation5] sm:$0xff]  ;;  %vm52_vm0 = vcmask 261120   ;;  %s199_s29 = smov [#allocation7]  }
  0x1d   :  { %v47_v2 = vld [vmem:[#allocation2 + $0x8] sm:$0xff]  ;;  %v50_v3 = vadd.f32 %v48_v1, %v46_v0  ;;  %v49_v4 = vld [vmem:[#allocation5 + $0x8] sm:$0xff]  ;;  %v118_v25 = vld [vmem:[%s257_s2] ss:$0 sm:$0xff]  ;;  %s105_s30 = sshll.u32 %s199_s29, 4  ;;  %s106_s30 = int_to_ptr.vmem [resolvable:$true] %s105_s30 }
  0x1e   :  { %v51_v5 = vadd.f32 %v49_v4, %v47_v2  ;;  %v119_v27 = vld [vmem:[%s258_s3] ss:$0 sm:$0xff]  ;;  %s169_s5 = scalar_lea.vmem %s106_s30, 256  ;;  %p174_p11 = scmp.lt.s32.totalorder %s106_s30, %s106_s30 }
  0x1f   :  { %v53_v6 = vsel %vm52_vm0, %v50_v3, 0.0  ;;  %p170_p10 = scmp.ne.s32.totalorder %s106_s30, %s169_s5  ;;  %p175_p12 = scmp.lt.s32.totalorder %s169_s5, %s169_s5 }
  0x20   :  { %54 = vadd.xlane.f32.xlu0 %v53_v6  ;;  %v56_v7 = vsel %vm52_vm0, %v51_v5, 0.0 }
  0x21   :  { %p176_p13 = por %p175_p12, %p174_p11 }
  0x23   :  { %p177_p0 = pnand %p176_p13, %p170_p10 }
  0x24   :  { %57 = vadd.xlane.f32.xlu0 %v56_v7 }
  0xa9   :  { %v55_v8 = vpop.xlane.xlu0 %54 }
  0xaa   :  { %v60_v9 = vmul.f32 0.03125, %v55_v8 }
  0xac   :  { %v62_v10 = vsub.f32 %v50_v3, %v60_v9 }
  0xad   :  { %v58_v11 = vpop.xlane.xlu0 %57 }
  0xae   :  { %v61_v12 = vmul.f32 0.03125, %v58_v11  ;;  %v64_v13 = vmul.f32 %v62_v10, %v62_v10 }
  0xb0   :  { %v63_v14 = vsub.f32 %v51_v5, %v61_v12  ;;  %v66_v15 = vsel %vm52_vm0, %v64_v13, 0.0 }
  0xb1   :  { %67 = vadd.xlane.f32.xlu1 %v66_v15 }
  0xb2   :  { %v65_v16 = vmul.f32 %v63_v14, %v63_v14 }
  0xb4   :  { %v69_v17 = vsel %vm52_vm0, %v65_v16, 0.0 }
  0xb5   :  { %70 = vadd.xlane.f32.xlu1 %v69_v17 }
 0x13a   :  { %v68_v18 = vpop.xlane.xlu1 %67 }
 0x13b   :  { %v72_v19 = vmul.f32 0.03125, %v68_v18 }
 0x13d   :  { %v74_v20 = vadd.f32 1e-05, %v72_v19 }
 0x13e   :  { %v71_v21 = vpop.xlane.xlu1 %70 }
 0x13f   :  { %125 = vrsqrt.f32 %v74_v20  ;;  %v73_v22 = vmul.f32 0.03125, %v71_v21 }
 0x141   :  { %v75_v23 = vadd.f32 1e-05, %v73_v22 }
 0x143   :  { %127 = vrsqrt.f32 %v75_v23 }
 0x14c   :  { %v126_v24 = vpop.eup %125 }
 0x14d   :  { %v78_v26 = vmul.f32 %v126_v24, %v62_v10 }
 0x14f   :  { %v87_v28 = vmul.f32 %v118_v25, %v78_v26 }
 0x150   :  { %v128_v29 = vpop.eup %127 }
 0x151   :  { %v79_v30 = vmul.f32 %v128_v29, %v63_v14  ;;  %v96_v31 = vadd.f32 %v119_v27, %v87_v28 }
 0x153   :  { %v88_v32 = vmul.f32 %v118_v25, %v79_v30  ;;  %98 = vst.msk [vmem:[#allocation7] sm:$0xff] %vm52_vm0, %v96_v31 }
 0x155   :  { %v97_v33 = vadd.f32 %v119_v27, %v88_v32 }
 0x157   :  { %99 = vst.msk [vmem:[#allocation7 + $0x8] sm:$0xff] %vm52_vm0, %v97_v33 }
 0x158   :  { %180 = shalt.err (!%p177_p0)
}
 0x159   :  { %111 = dma.vmem_to_hbm [thread:$0]  %s106_s30, 256, %s259_s4, [#allocation4], %s196_s18, %s196_s18, %s197_s19  }
 0x15a   :  { %193 = dma.done.wait [#allocation4], 256  }
 0x15b   :  { %194 = vsyncadd [#allocation4], 4294967040 }
 0x15c   :  { %115 = vsyncpa [#allocation3], 1 }
 0x15d   :  { %116 = vsyncpa [#allocation6], 1 }
 0x15e   :  { %117 = vsyncpa [#allocation4], 1 }

</bundles_post_ra>
